<compile_context>
chip_gen: v7x
topology: tpu7x:2x2x1
jax: 0.10.0
libtpu: 0.0.40
codegen_flags: <defaults>
</compile_context>

<pallas_src>
import functools

import jax
import jax.numpy as jnp
from jax import lax
from jax.experimental import pallas as pl
from jax.experimental.pallas import tpu as pltpu


def _global_emb_d_kernel(emb_ref, w_ref, out_ref, *, use_mxu):
    emb = emb_ref[...]                                        # (TN, H), native dtype

    if use_mxu:
        # Sub-32-bit inputs: weighted row-sum on the MXU (native bf16 operands,
        # f32 accumulate) -> frees the VALU slot, no f32 cast pass for the dot.
        s = jnp.dot(emb, w_ref[...], preferred_element_type=jnp.float32)    # (TN, 1)
    else:
        # f32 inputs: VPU multiply + reduce keeps the kernel HBM-bound.
        s = jnp.sum(emb * w_ref[...], axis=-1, keepdims=True)               # (TN, 1)

    # Row squared-norm: cast fused into the square, accumulated in f32.
    sq = jnp.sum(jnp.square(emb.astype(jnp.float32)), axis=-1, keepdims=True)
    # rsqrt(max(sq, 1e-24)) == 1 / max(||x||, 1e-12): F.normalize eps semantics;
    # all-zero rows give 0, never inf/NaN. rsqrt lands on the EUP slot (~free).
    inv_norm = lax.rsqrt(jnp.maximum(sq, 1e-24))
    out_ref[...] = s * inv_norm                               # scale already folded into w


def _choose_block_rows(N, H, itemsize, requested=None):
    """Row-tile size: multiple of 8, deliberate VMEM budget, >=2 tiles when N allows."""
    bytes_per_row = H * itemsize
    # <= 4 MiB per emb buffer => double-buffered input ~<= 8 MiB (+ small w and
    # (tn, 1) output buffers): comfortably inside v5e's 16 MiB scoped-VMEM default.
    cap_rows = max(8, ((4 << 20) // bytes_per_row) // 8 * 8)
    if requested is None:
        # >= ~1 MiB per DMA amortizes the per-grid-step overhead when H is small;
        # ~1024 rows sits at the HBM-roofline plateau when H is large.
        requested = max(1024, pl.cdiv(1 << 20, bytes_per_row))
    tn = max(8, (min(requested, cap_rows) // 8) * 8)
    if tn >= N:
        if N > 16:
            # Don't collapse to a single tile: split roughly in half so the
            # "parallel" row axis feeds both v7x TensorCores.
            tn = max(8, pl.cdiv(pl.cdiv(N, 2), 8) * 8)
        else:
            tn = N            # tiny input: full-dim block (always legal)
    return tn


def global_emb_d_forward(emb, d, summary, scale, *, block_rows=None):
    """emb: (N, H) f32/bf16, d: (H,), summary: (H, 1), scale: scalar or (1,)."""
    N, H = emb.shape
    assert summary.shape == (H, 1)

    # Fold diag(d) @ summary and the trailing *scale into one resident weight
    # vector, computed once in f32.
    w = (d.astype(jnp.float32) * summary[:, 0].astype(jnp.float32)
         * jnp.asarray(scale, jnp.float32).reshape(()))

    use_mxu = emb.dtype == jnp.bfloat16
    if use_mxu:
        w_arr = w.astype(jnp.bfloat16).reshape(H, 1)      # (H, 1) column for the MXU
    else:
        w_arr = w.reshape(1, H)                           # (1, H) row for VPU broadcast

    tn = _choose_block_rows(N, H, jnp.dtype(emb.dtype).itemsize, block_rows)
    grid_n = pl.cdiv(N, tn)

    kernel = functools.partial(_global_emb_d_kernel, use_mxu=use_mxu)
    out = pl.pallas_call(
        kernel,
        out_shape=jax.ShapeDtypeStruct((N, 1), jnp.float32),
        grid_spec=pltpu.PrefetchScalarGridSpec(
            num_scalar_prefetch=0,
            grid=(grid_n,),
            in_specs=[
                pl.BlockSpec((tn, H), lambda i: (i, 0)),        # emb row tiles (pipelined)
                pl.BlockSpec(w_arr.shape, lambda i: (0, 0)),    # resident weight vector
            ],
            out_specs=pl.BlockSpec((tn, 1), lambda i: (i, 0)),
        ),
        compiler_params=pltpu.CompilerParams(
            # Independent row tiles -> megacore sharding on v7x; neutral on v5e/v6e.
            dimension_semantics=("parallel",),
        ),
    )(emb, w_arr)
    return out


def _reference(emb, d, summary, scale):
    emb = emb.astype(jnp.float32)
    norm = jnp.maximum(jnp.linalg.norm(emb, axis=1, keepdims=True), 1e-12)
    emb_n = emb / norm
    sim = (emb_n * d[None, :].astype(jnp.float32)) @ summary.astype(jnp.float32)
    return sim * jnp.asarray(scale, jnp.float32).reshape(())


if __name__ == "__main__":
    key = jax.random.PRNGKey(0)
    k1, k2, k3, k4 = jax.random.split(key, 4)

    H = 32                                    # module hidden size (small demo)
    d = jnp.ones((H,), jnp.float32)           # torch.ones(n_hidden)
    scale = jnp.full((1,), 0.5, jnp.float32)  # torch.full((1,), 0.5)
    summary = jax.random.normal(k2, (H, 1), dtype=jnp.float32)

    # 1) Tiny batch, single-tile path (f32, VPU reduce).
    emb = jax.random.normal(k1, (8, H), dtype=jnp.float32)
    out = jax.block_until_ready(global_emb_d_forward(emb, d, summary, scale))
    ref = _reference(emb, d, summary, scale)
    assert out.shape == (8, 1)
    assert jnp.allclose(out, ref, atol=1e-5, rtol=1e-5)

    # 2) Larger batch, default tiling -> auto-split into >= 2 grid steps (v7x megacore).
    emb2 = jax.random.normal(k3, (64, H), dtype=jnp.float32)
    out2 = jax.block_until_ready(global_emb_d_forward(emb2, d, summary, scale))
    ref2 = _reference(emb2, d, summary, scale)
    assert out2.shape == (64, 1)
    assert jnp.allclose(out2, ref2, atol=1e-5, rtol=1e-5)

    # 3) Forced small tile -> multi-step grid with a partial (masked) last block.
    emb3 = jax.random.normal(k4, (200, H), dtype=jnp.float32)
    out3 = jax.block_until_ready(
        global_emb_d_forward(emb3, d, summary, scale, block_rows=16))
    ref3 = _reference(emb3, d, summary, scale)
    assert out3.shape == (200, 1)
    assert jnp.allclose(out3, ref3, atol=1e-5, rtol=1e-5)

    # 4) bf16 input -> MXU weighted-sum path (loose tolerance vs. f32 reference).
    emb4 = jax.random.normal(k1, (128, H), dtype=jnp.float32).astype(jnp.bfloat16)
    out4 = jax.block_until_ready(global_emb_d_forward(emb4, d, summary, scale))
    ref4 = _reference(emb4, d, summary, scale)
    assert out4.shape == (128, 1)
    assert jnp.allclose(out4, ref4, atol=3e-2, rtol=3e-2)

    print("KERNEL_OK")
</pallas_src>

<mosaic_0001>
module attributes {stable_mosaic.version = 11 : i64} {
  func.func @_global_emb_d_kernel(%arg0: i32, %arg1: memref<8x32xf32, #tpu.memory_space<vmem>>, %arg2: memref<1x32xf32, #tpu.memory_space<vmem>>, %arg3: memref<8x1xf32, #tpu.memory_space<vmem>>) attributes {dimension_semantics = [#tpu.dimension_semantics<parallel>], iteration_bounds = array<i64: 1>, scalar_prefetch = 0 : i64, scratch_operands = 0 : i64, tpu.core_type = #tpu.core_type<tc>, window_params = [{transform_indices = @transform_0, window_bounds = array<i64: 8, 32>}, {pipeline_mode = #tpu.pipeline_mode<synchronous>, transform_indices = @transform_1, window_bounds = array<i64: 1, 32>}, {transform_indices = @transform_2, window_bounds = array<i64: 8, 1>}]} {
    %c0 = arith.constant 0 : index
    %c0_0 = arith.constant 0 : index
    %0 = vector.load %arg1[%c0, %c0_0] : memref<8x32xf32, #tpu.memory_space<vmem>>, vector<8x32xf32>
    %c0_1 = arith.constant 0 : index
    %c0_2 = arith.constant 0 : index
    %1 = vector.load %arg2[%c0_1, %c0_2] : memref<1x32xf32, #tpu.memory_space<vmem>>, vector<1x32xf32>
    %2 = vector.broadcast %1 : vector<1x32xf32> to vector<8x32xf32>
    %3 = arith.mulf %0, %2 : vector<8x32xf32>
    %cst = arith.constant dense<0.000000e+00> : vector<8xf32>
    %4 = vector.multi_reduction <add>, %3, %cst [1] : vector<8x32xf32> to vector<8xf32>
    %5 = vector.shape_cast %4 : vector<8xf32> to vector<8x1xf32>
    %6 = arith.mulf %0, %0 : vector<8x32xf32>
    %cst_3 = arith.constant dense<0.000000e+00> : vector<8xf32>
    %7 = vector.multi_reduction <add>, %6, %cst_3 [1] : vector<8x32xf32> to vector<8xf32>
    %8 = vector.shape_cast %7 : vector<8xf32> to vector<8x1xf32>
    %cst_4 = arith.constant 1.000000e-24 : f32
    %9 = vector.broadcast %cst_4 : f32 to vector<8x1xf32>
    %10 = arith.maximumf %8, %9 : vector<8x1xf32>
    %11 = math.rsqrt %10 : vector<8x1xf32>
    %12 = arith.mulf %5, %11 : vector<8x1xf32>
    %c0_5 = arith.constant 0 : index
    %c0_6 = arith.constant 0 : index
    %13 = vector.load %arg3[%c0_5, %c0_6] : memref<8x1xf32, #tpu.memory_space<vmem>>, vector<8x1xf32>
    tpu.vector_store %arg3[%c0_5, %c0_6], %12 {strides = array<i32>} : memref<8x1xf32, #tpu.memory_space<vmem>>, vector<8x1xf32>,
    return
  }
  func.func @transform_0(%arg0: i32) -> (i32, i32) {
    %c0_i32 = arith.constant 0 : i32
    %c0_i32_0 = arith.constant 0 : i32
    return %arg0, %c0_i32 : i32, i32
  }
  func.func @transform_1(%arg0: i32) -> (i32, i32) {
    %c0_i32 = arith.constant 0 : i32
    %c0_i32_0 = arith.constant 0 : i32
    %c0_i32_1 = arith.constant 0 : i32
    return %c0_i32, %c0_i32_0 : i32, i32
  }
  func.func @transform_2(%arg0: i32) -> (i32, i32) {
    %c0_i32 = arith.constant 0 : i32
    %c0_i32_0 = arith.constant 0 : i32
    return %arg0, %c0_i32 : i32, i32
  }
}

</mosaic_0001>

<bundles_post_ra>
// kernel: tpu_custom_call.1
= control target key start
LH: loop header
LB: loop body
LE: loop exit
PB: predicated region body
PF: predicated region fallthrough
CT: control target
= control target key end

     0   :  { %7 = vsyncpa [#allocation3], 0  ;;  %s78_s9 = smov [#allocation2]   ;;  %s112_s0 = inlined_call_operand.hbm [shape: f32[8,32], index: 0, kind: input, shape index: {}]   ;;  %s113_s1 = inlined_call_operand.vmem [shape: f32[1,32], index: 1, kind: input, shape index: {}]   ;;  %s114_s2 = inlined_call_operand.vmem [shape: f32[8,1], index: 2, kind: output, shape index: {}]  }
   0x1   :  { %s14_s10 = sshll.u32 %s78_s9, 4  ;;  %s54_s13 = scalar_lea.hbm %s112_s0, 128  ;;  %s15_s10 = int_to_ptr.vmem [resolvable:$true] %s14_s10 }
   0x2   :  { %p55_p0 = scmp.ne.s32.totalorder %s112_s0, %s54_s13  ;;  %p58_p1 = scmp.lt.u32.totalorder %s54_s13, %s112_s0 }
   0x4   :  { %p60_p2 = pnand %p58_p1, %p55_p0 }
   0x6   :  { %63 = shalt.err (!%p60_p2)
}
   0x7   :  { %s64_s18 = scalar_lea.vmem %s15_s10, 128  ;;  %p69_p4 = scmp.lt.s32.totalorder %s15_s10, %s15_s10 }
   0x8   :  { %p65_p3 = scmp.ne.s32.totalorder %s15_s10, %s64_s18  ;;  %p70_p5 = scmp.lt.s32.totalorder %s64_s18, %s64_s18 }
   0xa   :  { %p71_p6 = por %p70_p5, %p69_p4 }
   0xc   :  { %p72_p7 = pnand %p71_p6, %p65_p3 }
   0xe   :  { %75 = shalt.err (!%p72_p7)
}
   0xf   :  { %17 = dma.hbm_to_vmem [thread:$0]  %s112_s0, 128, %s15_s10, [#allocation3]  }
  0x10   :  { %76 = dma.done.wait [#allocation3], 128  }
  0x11   :  { %77 = vsyncadd [#allocation3], 4294967168  ;;  %v23_v0 = vld [vmem:[#allocation2] sm:$0xff]  ;;  %vm32_vm0 = vcmask 261120   ;;  %vm43_vm1 = vcmask 7168  }
  0x12   :  { %v50_v1 = vld [vmem:[%s113_s1] ss:$0 sm:$0xff]  ;;  %v36_v2 = vmul.f32 %v23_v0, %v23_v0 }
  0x13   :  { %v31_v3 = vmul.f32 %v50_v1, %v23_v0 }
  0x14   :  { %v37_v4 = vsel %vm32_vm0, %v36_v2, 0.0 }
  0x15   :  { %38 = vadd.xlane.f32.xlu0 %v37_v4  ;;  %v33_v5 = vsel %vm32_vm0, %v31_v3, 0.0 }
  0x19   :  { %34 = vadd.xlane.f32.xlu0 %v33_v5 }
  0xa2   :  { %v39_v6 = vpop.xlane.xlu0 %38 }
  0xa3   :  { %v40_v7 = vmax.f32 %v39_v6, 1e-24 }
  0xa5   :  { %52 = vrsqrt.f32 %v40_v7 }
  0xa6   :  { %v35_v8 = vpop.xlane.xlu0 %34 }
  0xaf   :  { %v53_v9 = vpop.eup %52 }
  0xb0   :  { %v42_v10 = vmul.f32 %v53_v9, %v35_v8 }
  0xb2   :  { %44 = vst.msk [vmem:[%s114_s2] sm:$0xff] %vm43_vm1, %v42_v10 }
  0xb3   :  { %49 = vsyncpa [#allocation3], 1 }

</bundles_post_ra>
